<compile_context>
chip_gen: v7x
topology: tpu7x:2x2x1
jax: 0.10.0
libtpu: 0.0.40
codegen_flags: <defaults>
</compile_context>

<pallas_src>
import functools

import jax
import jax.numpy as jnp
from jax import lax
from jax.experimental import pallas as pl
from jax.experimental.pallas import tpu as pltpu


def _round_up(x, m):
    return (x + m - 1) // m * m


def _iou_partial_kernel(x_ref, y_ref, o_ref, tp_acc, sx_acc, sy_acc, *, tail):
    """Accumulate per-row tp / sum_x / sum_y over the spatial (lane) grid axis.

    Emits a (row_tile, 3) slab [tp, sum_x, sum_y] for this row block at the last
    spatial step.  `tail` is the static number of valid lanes in the last
    spatial tile (0 means the spatial extent divides the tile exactly).
    """
    k = pl.program_id(1)
    nk = pl.num_programs(1)

    @pl.when(k == 0)
    def _init():
        tp_acc[...] = jnp.zeros_like(tp_acc)
        sx_acc[...] = jnp.zeros_like(sx_acc)
        sy_acc[...] = jnp.zeros_like(sy_acc)

    x = x_ref[...].astype(jnp.float32)
    y = y_ref[...].astype(jnp.float32)

    def _accumulate(xv, yv):
        # One VPU multiply per element; three lane (XLU) reductions, keepdims so
        # everything stays in native 2-D (sublane, lane) layout.  The kernel is
        # DMA-bound, so this compute hides under the streaming copies.
        tp_acc[...] += jnp.sum(xv * yv, axis=-1, keepdims=True)
        sx_acc[...] += jnp.sum(xv, axis=-1, keepdims=True)
        sy_acc[...] += jnp.sum(yv, axis=-1, keepdims=True)

    if tail == 0:
        _accumulate(x, y)
    else:
        # Ragged last spatial tile: lanes >= tail are out of bounds and contain
        # whatever the edge-block DMA left behind -- mask their contributions
        # (applies to x, y and the product alike).
        @pl.when(k < nk - 1)
        def _full_tile():
            _accumulate(x, y)

        @pl.when(k == nk - 1)
        def _ragged_tile():
            lane = lax.broadcasted_iota(jnp.int32, x.shape, 1)
            valid = lane < tail
            _accumulate(jnp.where(valid, x, 0.0), jnp.where(valid, y, 0.0))

    @pl.when(k == nk - 1)
    def _emit():
        o_ref[...] = jnp.concatenate(
            [tp_acc[...], sx_acc[...], sy_acc[...]], axis=-1)


_ROW_CAP = 512  # max sublane rows per block (keeps tiles/accumulators sane for huge b*c)


def iou_loss(x, y, smooth=1.0, tile_lanes=None, tile_bytes=8 * 1024 * 1024):
    """IoU loss for x, y of shape (b, c, h, w); y must already be one-hot.

    Inputs may be f32 or bf16 (bf16 halves HBM traffic and is exact for the
    one-hot y); accumulation is always f32 in-kernel.  Returns a scalar f32.
    """
    # TODO(synk): optional fast path taking an integer label map (b, h, w) and
    # synthesizing y in-kernel via `labels == class` would cut GT HBM traffic ~c x.
    b, c, h, w = x.shape
    assert y.shape == x.shape, "this kernel expects gt already one-hot (b,c,h,w)"

    bc = b * c
    s = h * w
    itemsize = jnp.dtype(x.dtype).itemsize

    # ---- row (sublane) tiling -------------------------------------------------
    # Small b*c: single block whose height equals the full dim (exempt from the
    # 8-multiple rule -> no padding, no extra HBM pass).  Larger b*c: 8-multiple
    # row blocks, >=2 of them so the parallel grid axis can feed both v7x
    # TensorCores; garbage rows of a ragged last row block are discarded in the
    # JAX finalize below.
    if bc < 16:
        row_tile = bc
    else:
        target_blocks = max(2, pl.cdiv(bc, _ROW_CAP))
        row_tile = _round_up(pl.cdiv(bc, target_blocks), 8)
    n_row_blocks = pl.cdiv(bc, row_tile)
    rows_out = n_row_blocks * row_tile

    # ---- spatial (lane) tiling ------------------------------------------------
    if tile_lanes is None:
        tile_lanes = (tile_bytes // max(row_tile * itemsize, 1)) // 128 * 128
        tile_lanes = max(tile_lanes, 512)   # amortize ~0.35us per-grid-step overhead
    tile_lanes = max(128, tile_lanes // 128 * 128)
    tile_lanes = min(tile_lanes, _round_up(s, 128))
    n_k = pl.cdiv(s, tile_lanes)
    tail = s % tile_lanes                   # 0 => spatial extent divides the tile

    x2 = x.reshape(bc, s)                   # free reshape; no pad, no extra HBM traffic
    y2 = y.reshape(bc, s)

    cost = pl.CostEstimate(
        flops=4 * bc * s,                   # 1 mul + 3 accum-adds per element
        transcendentals=0,
        bytes_accessed=2 * bc * s * itemsize + rows_out * 3 * 4,
    )

    # 2 inputs x 2 pipeline buffers + lane-padded accumulators + output slab,
    # plus margin.  ~40 MiB with the 8 MiB/buffer default; <= v7x 64 MiB physical.
    block_bytes = row_tile * tile_lanes * itemsize
    vmem_need = (2 * 2 * block_bytes
                 + 3 * row_tile * 128 * 4
                 + 2 * row_tile * 128 * 4)
    vmem_limit = max(_round_up(vmem_need + (4 << 20), 1 << 20), 32 << 20)

    parts = pl.pallas_call(
        functools.partial(_iou_partial_kernel, tail=tail),
        out_shape=jax.ShapeDtypeStruct((rows_out, 3), jnp.float32),
        grid=(n_row_blocks, n_k),
        in_specs=[
            pl.BlockSpec((row_tile, tile_lanes), lambda r, k: (r, k)),
            pl.BlockSpec((row_tile, tile_lanes), lambda r, k: (r, k)),
        ],
        out_specs=pl.BlockSpec((row_tile, 3), lambda r, k: (r, 0)),
        scratch_shapes=[
            pltpu.VMEM((row_tile, 1), jnp.float32),   # tp accumulator
            pltpu.VMEM((row_tile, 1), jnp.float32),   # sum_x accumulator
            pltpu.VMEM((row_tile, 1), jnp.float32),   # sum_y accumulator
        ],
        compiler_params=pltpu.CompilerParams(
            dimension_semantics=("parallel", "arbitrary"),
            vmem_limit_bytes=vmem_limit,
        ),
        cost_estimate=cost,
    )(x2, y2)

    # Tiny finalize in plain JAX on (b*c, 3) values: drop garbage rows of a
    # ragged last row block, then iou + mean (matches batch_dice=False).
    tp = parts[:bc, 0]
    sx = parts[:bc, 1]
    sy = parts[:bc, 2]
    iou = (tp + smooth) / (sx + sy - tp + smooth)    # tp+fp+fn = sum_x+sum_y-tp
    return 1.0 - jnp.mean(iou)


def iou_loss_ref(x, y, smooth=1.0):
    """Pure-JAX reference mirroring the PyTorch IoULoss (default args)."""
    axes = (2, 3)
    xf = x.astype(jnp.float32)
    yf = y.astype(jnp.float32)
    tp = jnp.sum(xf * yf, axis=axes)
    fp = jnp.sum(xf * (1.0 - yf), axis=axes)
    fn = jnp.sum((1.0 - xf) * yf, axis=axes)
    iou = (tp + smooth) / (tp + fp + fn + smooth)
    return 1.0 - jnp.mean(iou)


def _make_inputs(key, b, c, h, w, dtype=jnp.float32):
    k1, k2 = jax.random.split(key)
    # Network output (apply_nonlin=None -> values used as-is; keep in [0,1]).
    x = jax.random.uniform(k1, (b, c, h, w), dtype=jnp.float32).astype(dtype)
    # Ground truth as a one-hot label map of shape (b, c, h, w).
    labels = jax.random.randint(k2, (b, h, w), 0, c)
    y = jax.nn.one_hot(labels, c, dtype=dtype)         # (b, h, w, c)
    y = jnp.transpose(y, (0, 3, 1, 2))                 # (b, c, h, w)
    return x, y


def _check(name, got, want, atol=1e-5, rtol=1e-5):
    assert jnp.allclose(got, want, atol=atol, rtol=rtol), (name, got, want)


if __name__ == "__main__":
    key = jax.random.PRNGKey(0)
    k1, k2, k3, k4 = jax.random.split(key, 4)

    # Case 1: several spatial tiles with a ragged tail (s=1024, tile 384 -> 3
    # steps, 256-lane tail) -- exercises accumulator + in-kernel tail mask.
    x1, y1 = _make_inputs(k1, 2, 4, 32, 32)                       # bc=8, s=1024
    l1 = iou_loss(x1, y1, smooth=1.0, tile_lanes=384)
    jax.block_until_ready(l1)
    _check("case1", l1, iou_loss_ref(x1, y1))

    # Case 2: b*c not a multiple of 8 (full-dim row block, no padding) and a
    # spatial extent not a multiple of 128 (single ragged tile).
    x2, y2 = _make_inputs(k2, 2, 3, 17, 19)                       # bc=6, s=323
    l2 = iou_loss(x2, y2, smooth=1.0)
    jax.block_until_ready(l2)
    _check("case2", l2, iou_loss_ref(x2, y2))

    # Case 3: b*c >= 16 -> two row blocks on the parallel grid axis (v7x
    # dual-TensorCore path), ragged last row block dropped in the JAX finalize.
    x3, y3 = _make_inputs(k3, 4, 5, 16, 16)                       # bc=20, s=256
    l3 = iou_loss(x3, y3, smooth=1.0)
    jax.block_until_ready(l3)
    _check("case3", l3, iou_loss_ref(x3, y3))

    # Case 4: bf16 inputs (halved HBM traffic); reference computed on the same
    # bf16-rounded values, f32 accumulation in both -> tight tolerance holds.
    x4, y4 = _make_inputs(k4, 2, 4, 32, 32, dtype=jnp.bfloat16)
    l4 = iou_loss(x4, y4, smooth=1.0, tile_lanes=512)
    jax.block_until_ready(l4)
    _check("case4", l4, iou_loss_ref(x4, y4))

    print("KERNEL_OK")
</pallas_src>

<mosaic_0001>
module attributes {stable_mosaic.version = 11 : i64} {
  func.func @_iou_partial_kernel(%arg0: i32, %arg1: i32, %arg2: memref<8x384xf32, #tpu.memory_space<vmem>>, %arg3: memref<8x384xf32, #tpu.memory_space<vmem>>, %arg4: memref<8x3xf32, #tpu.memory_space<vmem>>, %arg5: memref<8x1xf32, #tpu.memory_space<vmem>>, %arg6: memref<8x1xf32, #tpu.memory_space<vmem>>, %arg7: memref<8x1xf32, #tpu.memory_space<vmem>>) attributes {dimension_semantics = [#tpu.dimension_semantics<parallel>, #tpu.dimension_semantics<arbitrary>], iteration_bounds = array<i64: 1, 3>, scalar_prefetch = 0 : i64, scratch_operands = 3 : i64, tpu.core_type = #tpu.core_type<tc>, window_params = [{transform_indices = @transform_0, window_bounds = array<i64: 8, 384>}, {transform_indices = @transform_1, window_bounds = array<i64: 8, 384>}, {transform_indices = @transform_2, window_bounds = array<i64: 8, 3>}]} {
    %c0_i32 = arith.constant 0 : i32
    %0 = arith.cmpi eq, %arg1, %c0_i32 : i32
    %1 = arith.extui %0 : i1 to i32
    %c0_i32_0 = arith.constant 0 : i32
    %2 = arith.cmpi ne, %1, %c0_i32_0 : i32
    scf.if %2 {
      %cst = arith.constant 0.000000e+00 : f32
      %14 = vector.broadcast %cst : f32 to vector<8x1xf32>
      %c0_9 = arith.constant 0 : index
      %c0_10 = arith.constant 0 : index
      %15 = vector.load %arg5[%c0_9, %c0_10] : memref<8x1xf32, #tpu.memory_space<vmem>>, vector<8x1xf32>
      tpu.vector_store %arg5[%c0_9, %c0_10], %14 {strides = array<i32>} : memref<8x1xf32, #tpu.memory_space<vmem>>, vector<8x1xf32>,
      %cst_11 = arith.constant 0.000000e+00 : f32
      %16 = vector.broadcast %cst_11 : f32 to vector<8x1xf32>
      %c0_12 = arith.constant 0 : index
      %c0_13 = arith.constant 0 : index
      %17 = vector.load %arg6[%c0_12, %c0_13] : memref<8x1xf32, #tpu.memory_space<vmem>>, vector<8x1xf32>
      tpu.vector_store %arg6[%c0_12, %c0_13], %16 {strides = array<i32>} : memref<8x1xf32, #tpu.memory_space<vmem>>, vector<8x1xf32>,
      %cst_14 = arith.constant 0.000000e+00 : f32
      %18 = vector.broadcast %cst_14 : f32 to vector<8x1xf32>
      %c0_15 = arith.constant 0 : index
      %c0_16 = arith.constant 0 : index
      %19 = vector.load %arg7[%c0_15, %c0_16] : memref<8x1xf32, #tpu.memory_space<vmem>>, vector<8x1xf32>
      tpu.vector_store %arg7[%c0_15, %c0_16], %18 {strides = array<i32>} : memref<8x1xf32, #tpu.memory_space<vmem>>, vector<8x1xf32>,
    } else {
    }
    %c0 = arith.constant 0 : index
    %c0_1 = arith.constant 0 : index
    %3 = vector.load %arg2[%c0, %c0_1] : memref<8x384xf32, #tpu.memory_space<vmem>>, vector<8x384xf32>
    %c0_2 = arith.constant 0 : index
    %c0_3 = arith.constant 0 : index
    %4 = vector.load %arg3[%c0_2, %c0_3] : memref<8x384xf32, #tpu.memory_space<vmem>>, vector<8x384xf32>
    %c2_i32 = arith.constant 2 : i32
    %5 = arith.cmpi slt, %arg1, %c2_i32 : i32
    %6 = arith.extui %5 : i1 to i32
    %c0_i32_4 = arith.constant 0 : i32
    %7 = arith.cmpi ne, %6, %c0_i32_4 : i32
    scf.if %7 {
      %c0_9 = arith.constant 0 : index
      %c0_10 = arith.constant 0 : index
      %14 = vector.load %arg5[%c0_9, %c0_10] : memref<8x1xf32, #tpu.memory_space<vmem>>, vector<8x1xf32>
      %15 = arith.mulf %3, %4 : vector<8x384xf32>
      %cst = arith.constant dense<0.000000e+00> : vector<8xf32>
      %16 = vector.multi_reduction <add>, %15, %cst [1] : vector<8x384xf32> to vector<8xf32>
      %17 = vector.shape_cast %16 : vector<8xf32> to vector<8x1xf32>
      %18 = arith.addf %14, %17 : vector<8x1xf32>
      %c0_11 = arith.constant 0 : index
      %c0_12 = arith.constant 0 : index
      %19 = vector.load %arg5[%c0_11, %c0_12] : memref<8x1xf32, #tpu.memory_space<vmem>>, vector<8x1xf32>
      tpu.vector_store %arg5[%c0_11, %c0_12], %18 {strides = array<i32>} : memref<8x1xf32, #tpu.memory_space<vmem>>, vector<8x1xf32>,
      %c0_13 = arith.constant 0 : index
      %c0_14 = arith.constant 0 : index
      %20 = vector.load %arg6[%c0_13, %c0_14] : memref<8x1xf32, #tpu.memory_space<vmem>>, vector<8x1xf32>
      %cst_15 = arith.constant dense<0.000000e+00> : vector<8xf32>
      %21 = vector.multi_reduction <add>, %3, %cst_15 [1] : vector<8x384xf32> to vector<8xf32>
      %22 = vector.shape_cast %21 : vector<8xf32> to vector<8x1xf32>
      %23 = arith.addf %20, %22 : vector<8x1xf32>
      %c0_16 = arith.constant 0 : index
      %c0_17 = arith.constant 0 : index
      %24 = vector.load %arg6[%c0_16, %c0_17] : memref<8x1xf32, #tpu.memory_space<vmem>>, vector<8x1xf32>
      tpu.vector_store %arg6[%c0_16, %c0_17], %23 {strides = array<i32>} : memref<8x1xf32, #tpu.memory_space<vmem>>, vector<8x1xf32>,
      %c0_18 = arith.constant 0 : index
      %c0_19 = arith.constant 0 : index
      %25 = vector.load %arg7[%c0_18, %c0_19] : memref<8x1xf32, #tpu.memory_space<vmem>>, vector<8x1xf32>
      %cst_20 = arith.constant dense<0.000000e+00> : vector<8xf32>
      %26 = vector.multi_reduction <add>, %4, %cst_20 [1] : vector<8x384xf32> to vector<8xf32>
      %27 = vector.shape_cast %26 : vector<8xf32> to vector<8x1xf32>
      %28 = arith.addf %25, %27 : vector<8x1xf32>
      %c0_21 = arith.constant 0 : index
      %c0_22 = arith.constant 0 : index
      %29 = vector.load %arg7[%c0_21, %c0_22] : memref<8x1xf32, #tpu.memory_space<vmem>>, vector<8x1xf32>
      tpu.vector_store %arg7[%c0_21, %c0_22], %28 {strides = array<i32>} : memref<8x1xf32, #tpu.memory_space<vmem>>, vector<8x1xf32>,
    } else {
    }
    %c2_i32_5 = arith.constant 2 : i32
    %8 = arith.cmpi eq, %arg1, %c2_i32_5 : i32
    %9 = arith.extui %8 : i1 to i32
    %c0_i32_6 = arith.constant 0 : i32
    %10 = arith.cmpi ne, %9, %c0_i32_6 : i32
    scf.if %10 {
      %14 = tpu.iota {dimensions = array<i32: 1>} : vector<8x384xi32>
      %c256_i32 = arith.constant 256 : i32
      %15 = vector.broadcast %c256_i32 : i32 to vector<8x384xi32>
      %16 = arith.cmpi slt, %14, %15 : vector<8x384xi32>
      %cst = arith.constant 0.000000e+00 : f32
      %17 = vector.broadcast %cst : f32 to vector<8x384xf32>
      %18 = arith.select %16, %3, %17 : vector<8x384xi1>, vector<8x384xf32>
      %cst_9 = arith.constant 0.000000e+00 : f32
      %19 = vector.broadcast %cst_9 : f32 to vector<8x384xf32>
      %20 = arith.select %16, %4, %19 : vector<8x384xi1>, vector<8x384xf32>
      %c0_10 = arith.constant 0 : index
      %c0_11 = arith.constant 0 : index
      %21 = vector.load %arg5[%c0_10, %c0_11] : memref<8x1xf32, #tpu.memory_space<vmem>>, vector<8x1xf32>
      %22 = arith.mulf %18, %20 : vector<8x384xf32>
      %cst_12 = arith.constant dense<0.000000e+00> : vector<8xf32>
      %23 = vector.multi_reduction <add>, %22, %cst_12 [1] : vector<8x384xf32> to vector<8xf32>
      %24 = vector.shape_cast %23 : vector<8xf32> to vector<8x1xf32>
      %25 = arith.addf %21, %24 : vector<8x1xf32>
      %c0_13 = arith.constant 0 : index
      %c0_14 = arith.constant 0 : index
      %26 = vector.load %arg5[%c0_13, %c0_14] : memref<8x1xf32, #tpu.memory_space<vmem>>, vector<8x1xf32>
      tpu.vector_store %arg5[%c0_13, %c0_14], %25 {strides = array<i32>} : memref<8x1xf32, #tpu.memory_space<vmem>>, vector<8x1xf32>,
      %c0_15 = arith.constant 0 : index
      %c0_16 = arith.constant 0 : index
      %27 = vector.load %arg6[%c0_15, %c0_16] : memref<8x1xf32, #tpu.memory_space<vmem>>, vector<8x1xf32>
      %cst_17 = arith.constant dense<0.000000e+00> : vector<8xf32>
      %28 = vector.multi_reduction <add>, %18, %cst_17 [1] : vector<8x384xf32> to vector<8xf32>
      %29 = vector.shape_cast %28 : vector<8xf32> to vector<8x1xf32>
      %30 = arith.addf %27, %29 : vector<8x1xf32>
      %c0_18 = arith.constant 0 : index
      %c0_19 = arith.constant 0 : index
      %31 = vector.load %arg6[%c0_18, %c0_19] : memref<8x1xf32, #tpu.memory_space<vmem>>, vector<8x1xf32>
      tpu.vector_store %arg6[%c0_18, %c0_19], %30 {strides = array<i32>} : memref<8x1xf32, #tpu.memory_space<vmem>>, vector<8x1xf32>,
      %c0_20 = arith.constant 0 : index
      %c0_21 = arith.constant 0 : index
      %32 = vector.load %arg7[%c0_20, %c0_21] : memref<8x1xf32, #tpu.memory_space<vmem>>, vector<8x1xf32>
      %cst_22 = arith.constant dense<0.000000e+00> : vector<8xf32>
      %33 = vector.multi_reduction <add>, %20, %cst_22 [1] : vector<8x384xf32> to vector<8xf32>
      %34 = vector.shape_cast %33 : vector<8xf32> to vector<8x1xf32>
      %35 = arith.addf %32, %34 : vector<8x1xf32>
      %c0_23 = arith.constant 0 : index
      %c0_24 = arith.constant 0 : index
      %36 = vector.load %arg7[%c0_23, %c0_24] : memref<8x1xf32, #tpu.memory_space<vmem>>, vector<8x1xf32>
      tpu.vector_store %arg7[%c0_23, %c0_24], %35 {strides = array<i32>} : memref<8x1xf32, #tpu.memory_space<vmem>>, vector<8x1xf32>,
    } else {
    }
    %c2_i32_7 = arith.constant 2 : i32
    %11 = arith.cmpi eq, %arg1, %c2_i32_7 : i32
    %12 = arith.extui %11 : i1 to i32
    %c0_i32_8 = arith.constant 0 : i32
    %13 = arith.cmpi ne, %12, %c0_i32_8 : i32
    scf.if %13 {
      %c0_9 = arith.constant 0 : index
      %c0_10 = arith.constant 0 : index
      %14 = vector.load %arg5[%c0_9, %c0_10] : memref<8x1xf32, #tpu.memory_space<vmem>>, vector<8x1xf32>
      %c0_11 = arith.constant 0 : index
      %c0_12 = arith.constant 0 : index
      %15 = vector.load %arg6[%c0_11, %c0_12] : memref<8x1xf32, #tpu.memory_space<vmem>>, vector<8x1xf32>
      %c0_13 = arith.constant 0 : index
      %c0_14 = arith.constant 0 : index
      %16 = vector.load %arg7[%c0_13, %c0_14] : memref<8x1xf32, #tpu.memory_space<vmem>>, vector<8x1xf32>
      %17 = tpu.concatenate %14, %15, %16 in 1 : vector<8x1xf32>, vector<8x1xf32>, vector<8x1xf32> -> vector<8x3xf32>
      %c0_15 = arith.constant 0 : index
      %c0_16 = arith.constant 0 : index
      %18 = vector.load %arg4[%c0_15, %c0_16] : memref<8x3xf32, #tpu.memory_space<vmem>>, vector<8x3xf32>
      tpu.vector_store %arg4[%c0_15, %c0_16], %17 {strides = array<i32>} : memref<8x3xf32, #tpu.memory_space<vmem>>, vector<8x3xf32>,
    } else {
    }
    return
  }
  func.func @transform_0(%arg0: i32, %arg1: i32) -> (i32, i32) {
    %c0_i32 = arith.constant 0 : i32
    return %arg0, %arg1 : i32, i32
  }
  func.func @transform_1(%arg0: i32, %arg1: i32) -> (i32, i32) {
    %c0_i32 = arith.constant 0 : i32
    return %arg0, %arg1 : i32, i32
  }
  func.func @transform_2(%arg0: i32, %arg1: i32) -> (i32, i32) {
    %c0_i32 = arith.constant 0 : i32
    %c0_i32_0 = arith.constant 0 : i32
    return %arg0, %c0_i32 : i32, i32
  }
}

</mosaic_0001>

<bundles_post_ra>
// kernel: tpu_custom_call.1
= control target key start
LH: loop header
LB: loop body
LE: loop exit
PB: predicated region body
PF: predicated region fallthrough
CT: control target
= control target key end

     0   :  { %7 = vsyncpa [#allocation6], 0  ;;  %s816_s0 = inlined_call_operand.hbm [shape: f32[8,1024], index: 0, kind: input, shape index: {}]   ;;  %s817_s1 = inlined_call_operand.hbm [shape: f32[8,1024], index: 1, kind: input, shape index: {}]   ;;  %s818_s2 = inlined_call_operand.vmem [shape: f32[8,3], index: 2, kind: output, shape index: {}]  }
   0x1   :  { %9 = vsyncpa [#allocation6 + $0x1], 0 }
   0x2   :  { %10 = vsyncpa [#allocation8], 0 }
   0x3   :  { %12 = vsyncpa [#allocation8 + $0x1], 0  ;;  %s650_s9 = smov 0   ;;  %s652_s10 = smov 0  }
   0x4   :  { %s654_s11 = smov 0   ;;  %s656_s12 = smov 0  }
   0x5   :  { %s658_s13 = smov 0   ;;  %s660_s14 = smov 0  }
   0x6 LB: > { %s440_s15 = sadd.s32 4294967295, %s628_s14   ;;  %s27_s16 = sadd.s32 1, %s624_s13  ;;  %s628_s14 = sphi %s660_s14, %s18_s14   ;;  %s624_s13 = sphi %s658_s13, %s829_s13   ;;  %s620_s12 = sphi %s656_s12, %s828_s12   ;;  %s616_s11 = sphi %s654_s11, %s827_s11   ;;  %s612_s10 = sphi %s652_s10, %s826_s10   ;;  %s608_s9 = sphi %s650_s9, %s825_s9  }
   0x7   : > { %p28_p0 = scmp.ge.s32.totalorder %s27_s16, 3  ;;  %s39_s17 = sadd.s32 1, %s616_s11 }
   0x8   : > { %p46_p1 = scmp.ne.s32.totalorder %s616_s11, %s612_s10  ;;  %p47_p2 = scmp.eq.s32.totalorder %s628_s14, 0 }
   0x9   : > { %s831_s16 = smov (%p28_p0, %s27_s16), 0  ;;  %p52_p4 = scmp.ne.s32.totalorder %s612_s10, %s608_s9 }
   0xa   : > { %p686_p3 = por %p47_p2, %p46_p1  ;;  %s35_s19 = ssub.s32 %s624_s13, %s831_s16 }
   0xb   : > { %p53_p5 = scmp.eq.s32.totalorder %s440_s15, 0  ;;  %p37_p6 = scmp.eq.s32.totalorder %s35_s19, 0 }
   0xc   : > { %s821_s18 = scalar_select %p686_p3, 1, 0 }
   0xd   : > { %p693_p7 = por %p53_p5, %p52_p4  ;;  %p442_p8 = scmp.ge.s32.totalorder %s628_s14, 3 }
   0xe   : > { %s698_s21 = scalar_select %p37_p6, %s616_s11, %s39_s17  }
   0xf   : > { %s822_s20 = scalar_select %p693_p7, 1, 0 }
  0x10   : > { %126 = sbr.rel (%p442_p8) target bundleno = 93 (0x5d), region = 16 }
  0x17   : > { %129 = sbr.rel (!%p686_p3) target bundleno = 57 (0x39), region = 20  ;;  %s130_s22 = sand.u32 (%p686_p3), 1, %s616_s11  }
  0x18   : > { %s135_s23 = smul.u32 (%p686_p3), 3, %s624_s13  ;;  %s708_s28 = scalar_lea.sflag (%p686_p3), [#allocation6], %s130_s22 }
  0x19   : > { %s462_s24 = smul.u32 (%p686_p3), 24, %s130_s22 }
  0x1a   : > { %s136_s25 = ssub.s32 (%p686_p3), 8, %s135_s23 }
  0x1b   : > { %p137_p9 = scmp.lt.s32.totalorder (%p686_p3), %s136_s25, 3  ;;  %s134_s29 = scalar_lea.vmem (%p686_p3), [#allocation5], %s462_s24 }
  0x1e   : > { %s833_s25 = smov (!%p137_p9, %s136_s25), 3 }
  0x1f   : > { %s705_s26 = sshll.u32 %s833_s25, 7 }
  0x20   : > { %s141_s27 = ssub.s32 384, %s705_s26 }
  0x21   : > { %142 = vsyncadd %s708_s28, %s141_s27  ;;  %p444_p10 = scmp.ne.s32.totalorder %s705_s26, 0  ;;  %s460_s30 = smul.u32 384, %s624_s13 }
  0x22   : > { %s150_s3 = sshll.u32 %s134_s29, 4  ;;  %s522_s15 = scalar_lea.hbm %s816_s0, 1024  ;;  %s151_s3 = int_to_ptr.vmem [resolvable:$true] %s150_s3 }
  0x23   : > { %s716_s6 = scalar_lea.hbm %s816_s0, %s460_s30 }
  0x24   : > { %s518_s7 = scalar_lea.hbm %s716_s6, %s705_s26  ;;  %p523_p0 = scmp.lt.u32.totalorder %s716_s6, %s816_s0 }
  0x25   : > { %p519_p11 = scmp.ne.s32.totalorder %s716_s6, %s518_s7  ;;  %p524_p1 = scmp.lt.u32.totalorder %s522_s15, %s518_s7 }
  0x26   : > { %p526_p4 = scmp.lt.u32.totalorder %s518_s7, %s716_s6 }
  0x27   : > { %p520_p12 = pnand %p519_p11, %p444_p10  ;;  %p525_p2 = por %p524_p1, %p523_p0 }
  0x29   : > { %p521_p13 = pneg %p520_p12  ;;  %p527_p5 = por %p526_p4, %p525_p2 }
  0x2b   : > { %p528_p6 = pnand %p527_p5, %p521_p13 }
  0x2d   : > { %531 = shalt.err (!%p528_p6)
}
  0x2e   : > { %s532_s22 = scalar_lea.vmem %s151_s3, %s705_s26  ;;  %s630_s23 = smov [#allocation5]  }
  0x2f   : > { %p533_p8 = scmp.ne.s32.totalorder %s151_s3, %s532_s22  ;;  %s536_s24 = sshll.u32 %s630_s23, 4  ;;  %s537_s24 = int_to_ptr.vmem [resolvable:$false] %s536_s24 }
  0x30   : > { %s538_s25 = scalar_lea.vmem %s537_s24, 768  ;;  %p539_p12 = scmp.lt.s32.totalorder %s151_s3, %s537_s24 }
  0x31   : > { %p534_p9 = pnand %p533_p8, %p444_p10  ;;  %p540_p7 = scmp.lt.s32.totalorder %s538_s25, %s532_s22 }
  0x33   : > { %p535_p11 = pneg %p534_p9  ;;  %p541_p3 = por %p540_p7, %p539_p12 }
  0x35   : > { %p542_p0 = pnand %p541_p3, %p535_p11 }
  0x37   : > { %545 = shalt.err (!%p542_p0)
}
  0x38   : > { %153 = dma.hbm_to_vmem [thread:$0]  (%p444_p10), %s716_s6, %s705_s26, %s151_s3, %s708_s28  }
  0x39 PF: > { %p823_p13 = scmp.ne.s32.totalorder %s821_s18, 0 }
  0x3a   : > { %s157_s27 = sand.u32 (%p823_p13), 1, %s616_s11   ;;  %s162_s29 = smul.u32 (%p823_p13), 3, %s624_s13 }
  0x3b   : > { %156 = sbr.rel (!%p823_p13) target bundleno = 93 (0x5d), region = 24  ;;  %s746_s8 = scalar_lea.sflag (%p823_p13), [#allocation8], %s157_s27 }
  0x3c   : > { %s463_s30 = smul.u32 (%p823_p13), 24, %s157_s27  ;;  %s163_s4 = ssub.s32 (%p823_p13), 8, %s162_s29 }
  0x3d   : > { %p164_p1 = scmp.lt.s32.totalorder (%p823_p13), %s163_s4, 3 }
  0x3e   : > { %s161_s26 = scalar_lea.vmem (%p823_p13), [#allocation7], %s463_s30 }
  0x42   : > { %s835_s4 = smov (!%p164_p1, %s163_s4), 3 }
  0x43   : > { %s743_s5 = sshll.u32 %s835_s4, 7 }
  0x44   : > { %s168_s7 = ssub.s32 384, %s743_s5 }
  0x45   : > { %169 = vsyncadd %s746_s8, %s168_s7  ;;  %p449_p3 = scmp.ne.s32.totalorder %s743_s5, 0  ;;  %s461_s18 = smul.u32 384, %s624_s13 }
  0x46   : > { %s177_s28 = sshll.u32 %s161_s26, 4  ;;  %s550_s22 = scalar_lea.hbm %s817_s1, 1024  ;;  %s178_s28 = int_to_ptr.vmem [resolvable:$true] %s177_s28 }
  0x47   : > { %s754_s9 = scalar_lea.hbm %s817_s1, %s461_s18 }
  0x48   : > { %s546_s15 = scalar_lea.hbm %s754_s9, %s743_s5  ;;  %p551_p4 = scmp.lt.u32.totalorder %s754_s9, %s817_s1 }
  0x49   : > { %p547_p7 = scmp.ne.s32.totalorder %s754_s9, %s546_s15  ;;  %p552_p5 = scmp.lt.u32.totalorder %s550_s22, %s546_s15 }
  0x4a   : > { %p554_p8 = scmp.lt.u32.totalorder %s546_s15, %s754_s9 }
  0x4b   : > { %p548_p10 = pnand %p547_p7, %p449_p3  ;;  %p553_p6 = por %p552_p5, %p551_p4 }
  0x4d   : > { %p549_p2 = pneg %p548_p10  ;;  %p555_p9 = por %p554_p8, %p553_p6 }
  0x4f   : > { %p556_p11 = pnand %p555_p9, %p549_p2 }
  0x51   : > { %559 = shalt.err (!%p556_p11)
}
  0x52   : > { %s560_s25 = scalar_lea.vmem %s178_s28, %s743_s5  ;;  %s631_s27 = smov [#allocation7]  }
  0x53   : > { %p561_p12 = scmp.ne.s32.totalorder %s178_s28, %s560_s25  ;;  %s564_s29 = sshll.u32 %s631_s27, 4  ;;  %s565_s29 = int_to_ptr.vmem [resolvable:$false] %s564_s29 }
  0x54   : > { %s566_s30 = scalar_lea.vmem %s565_s29, 768  ;;  %p567_p1 = scmp.lt.s32.totalorder %s178_s28, %s565_s29 }
  0x55   : > { %p562_p0 = pnand %p561_p12, %p449_p3  ;;  %p568_p7 = scmp.lt.s32.totalorder %s566_s30, %s560_s25 }
  0x57   : > { %p563_p13 = pneg %p562_p0  ;;  %p569_p10 = por %p568_p7, %p567_p1 }
  0x59   : > { %p570_p4 = pnand %p569_p10, %p563_p13 }
  0x5b   : > { %573 = shalt.err (!%p570_p4)
}
  0x5c   : > { %180 = dma.hbm_to_vmem [thread:$0]  (%p449_p3), %s754_s9, %s743_s5, %s178_s28, %s746_s8  }
  0x5d PF: > { %p453_p2 = scmp.ge.s32.totalorder %s628_s14, 1  ;;  %p182_p5 = scmp.lt.s32.totalorder %s628_s14, 4 }
  0x5f   : > { %p183_p6 = pnand %p453_p2, %p182_p5 }
  0x60   : > { %s188_s4 = sand.u32 (!%p183_p6), 1, %s612_s10   ;;  %p824_p8 = scmp.ne.s32.totalorder (!%p183_p6), %s822_s20, 0 }
  0x61   : > { %186 = sbr.rel (%p183_p6) target bundleno = 549 (0x225), region = 28  ;;  %s189_s26 = scalar_lea.sflag (!%p183_p6), [#allocation6], %s188_s4 }
  0x62   : > { %s464_s7 = smul.u32 (!%p183_p6), 24, %s188_s4 }
  0x64   : > { %s192_s18 = scalar_lea.vmem (!%p183_p6), [#allocation5], %s464_s7 }
  0x68   : > { %599 = dma.done.wait (%p824_p8), %s189_s26, 384  }
  0x69   : > { %601 = vsyncadd (%p824_p8), %s189_s26, 4294966912  ;;  %s198_s5 = scalar_lea.sflag [#allocation8], %s188_s4  ;;  %s201_s8 = scalar_lea.vmem [#allocation7], %s464_s7 }
  0x6a   : > { %603 = dma.done.wait (%p824_p8), %s198_s5, 384  }
  0x6b   : > { %605 = vsyncadd (%p824_p8), %s198_s5, 4294966912  ;;  %p454_p3 = scmp.ne.s32.totalorder %s620_s12, 0 }
  0x6c   : > { %vm244_vm0 = vcmask (!%p454_p3), 7168   ;;  %v632_v0 = vmov (!%p454_p3), 0.0  }
  0x6d   : > { %243 = sbr.rel (%p454_p3) target bundleno = 116 (0x74), region = 40  ;;  %245 = vst.msk [vmem:[#allocation2] sm:$0xff] (!%p454_p3), %vm244_vm0, %v632_v0  ;;  %246 = vst.msk [vmem:[#allocation3] sm:$0xff] (!%p454_p3), %vm244_vm0, %v632_v0 }
  0x6e   : > { %247 = vst.msk [vmem:[#allocation4] sm:$0xff] (!%p454_p3), %vm244_vm0, %v632_v0 }
  0x74 PF: > { %v248_v1 = vld [vmem:[%s192_s18] sm:$0xff]  ;;  %v249_v2 = vld [vmem:[%s192_s18 + $0x8] sm:$0xff]  ;;  %v250_v3 = vld [vmem:[%s192_s18 + $0x10] sm:$0xff]  ;;  %p455_p9 = scmp.ge.s32.totalorder %s620_s12, 2 }
  0x75   : > { %v251_v4 = vld [vmem:[%s201_s8] sm:$0xff]  ;;  %v252_v5 = vld [vmem:[%s201_s8 + $0x8] sm:$0xff]  ;;  %v253_v6 = vld [vmem:[%s201_s8 + $0x10] sm:$0xff]  ;;  %v270_v13 = vadd.f32 (!%p455_p9), %v249_v2, %v248_v1  ;;  %vm267_vm1 = vcmask (!%p455_p9), 7168  }
  0x76   : > { %257 = sbr.rel (%p455_p9) target bundleno = 273 (0x111), region = 44  ;;  %v259_v7 = vmul.f32 (!%p455_p9), %v251_v4, %v248_v1  ;;  %v260_v8 = vmul.f32 (!%p455_p9), %v252_v5, %v249_v2  ;;  %v261_v9 = vmul.f32 (!%p455_p9), %v253_v6, %v250_v3  ;;  %v277_v10 = vadd.f32 (!%p455_p9), %v252_v5, %v251_v4  ;;  %v276_v16 = vld [vmem:[#allocation4] sm:$0xff] (!%p455_p9)  ;;  %v258_v17 = vld [vmem:[#allocation2] sm:$0xff] (!%p455_p9)  ;;  %v269_v22 = vld [vmem:[#allocation3] sm:$0xff] (!%p455_p9) }
  0x77   : > { %v271_v15 = vadd.f32 (!%p455_p9), %v270_v13, %v250_v3 }
  0x78   : > { %v262_v11 = vadd.f32 (!%p455_p9), %v260_v8, %v259_v7  ;;  %v278_v12 = vadd.f32 (!%p455_p9), %v277_v10, %v253_v6 }
  0x7a   : > { %v263_v14 = vadd.f32 (!%p455_p9), %v262_v11, %v261_v9  ;;  %279 = vadd.xlane.f32.xlu1 (!%p455_p9), %v278_v12 }
  0x7c   : > { %264 = vadd.xlane.f32.xlu0 (!%p455_p9), %v263_v14 }
  0x80   : > { %272 = vadd.xlane.f32.xlu0 %v271_v15 }
 0x107   : > { %v280_v18 = vpop.xlane.xlu1 %279 }
 0x108   : > { %v281_v19 = vadd.f32 %v280_v18, %v276_v16 }
 0x109   : > { %v265_v20 = vpop.xlane.xlu0 %264 }
 0x10a   : > { %v266_v21 = vadd.f32 %v265_v20, %v258_v17  ;;  %282 = vst.msk [vmem:[#allocation4] sm:$0xff] %vm267_vm1, %v281_v19 }
 0x10c   : > { %268 = vst.msk [vmem:[#allocation2] sm:$0xff] %vm267_vm1, %v266_v21 }
 0x10d   : > { %v273_v23 = vpop.xlane.xlu0 %272 }
 0x10e   : > { %v274_v24 = vadd.f32 %v273_v23, %v269_v22 }
 0x110   : > { %275 = vst.msk [vmem:[#allocation3] sm:$0xff] %vm267_vm1, %v274_v24 }
 0x111 PF: > { %p456_p11 = scmp.ne.s32.totalorder %s620_s12, 2 }
 0x112   : > { %v312_v25 = vadd.f32 (!%p456_p11), %v249_v2, %v248_v1  ;;  %v301_v26 = vmul.f32 (!%p456_p11), %v251_v4, %v248_v1  ;;  %v302_v27 = vmul.f32 (!%p456_p11), %v252_v5, %v249_v2  ;;  %v319_v28 = vadd.f32 (!%p456_p11), %v252_v5, %v251_v4  ;;  %v318_v34 = vld [vmem:[#allocation4] sm:$0xff] (!%p456_p11)  ;;  %s633_s12 = smov (!%p456_p11), 1   ;;  %s634_s20 = smov (!%p456_p11), 2  }
 0x113   : > { %286 = sbr.rel (%p456_p11) target bundleno = 549 (0x225), region = 48  ;;  %vm309_vm2 = vcmask (!%p456_p11), 7168   ;;  %v300_v32 = vld [vmem:[#allocation2] sm:$0xff] (!%p456_p11)  ;;  %vm337_vm3 = vcmask (!%p456_p11), 15360   ;;  %vm339_vm4 = vcmask (!%p456_p11), 23552  }
 0x114   : > { %314 = vadd.xlane.f32.xlu0 (!%p456_p11), %v312_v25  ;;  %v304_v29 = vadd.f32 (!%p456_p11), %v302_v27, %v301_v26 }
 0x116   : > { %306 = vadd.xlane.f32.xlu1 (!%p456_p11), %v304_v29 }
 0x117   : > { %v311_v30 = vld [vmem:[#allocation3] sm:$0xff] (!%p456_p11) }
 0x118   : > { %321 = vadd.xlane.f32.xlu0 (!%p456_p11), %v319_v28 }
 0x1a1   : > { %v315_v31 = vpop.xlane.xlu0 %314 }
 0x1a2   : > { %v316_v33 = vadd.f32 %v315_v31, %v311_v30 }
 0x1a3   : > { %v307_v35 = vpop.xlane.xlu1 %306 }
 0x1a4   : > { %317 = vst.msk [vmem:[#allocation3] sm:$0xff] %vm309_vm2, %v316_v33  ;;  %v308_v36 = vadd.f32 %v307_v35, %v300_v32 }
 0x1a5   : > { %v322_v37 = vpop.xlane.xlu0 %321 }
 0x1a6   : > { %v323_v38 = vadd.f32 %v322_v37, %v318_v34  ;;  %310 = vst.msk [vmem:[#allocation2] sm:$0xff] %vm309_vm2, %v308_v36 }
 0x1a8   : > { %324 = vst.msk [vmem:[#allocation4] sm:$0xff] %vm309_vm2, %v323_v38 }
 0x1ab   : > { %v326_v39 = vld [vmem:[#allocation3] sm:$0xff] }
 0x1ac   : > { %329 = vrot.lane.b32.xlu1 %v326_v39, %s633_s12 }
 0x1ad   : > { %v325_v42 = vld [vmem:[#allocation2] sm:$0xff] }
 0x1af   : > { %v327_v40 = vld [vmem:[#allocation4] sm:$0xff] }
 0x1b0   : > { %333 = vrot.lane.b32.xlu0 %v327_v40, %s634_s20 }
 0x21e   : > { %v330_v41 = vpop.permute.xlu1 %329 }
 0x21f   : > { %v336_v43 = vsel %vm309_vm2, %v325_v42, %v330_v41 }
 0x222   : > { %v334_v44 = vpop.permute.xlu0 %333 }
 0x223   : > { %v338_v45 = vsel %vm337_vm3, %v336_v43, %v334_v44 }
 0x224   : > { %340 = vst.msk [vmem:[%s818_s2] sm:$0xff] %vm339_vm4, %v338_v45 }
 0x225 PF: > { %s18_s14 = sadd.s32 1, %s628_s14   ;;  %s825_s9 = smov %s612_s10 }
 0x226   : > { %p15_p12 = scmp.ge.s32.totalorder %s18_s14, 5   ;;  %s826_s10 = smov %s616_s11 }
 0x227   : > { %s827_s11 = smov %s698_s21  ;;  %s828_s12 = smov %s624_s13 }
 0x228   : > { %s829_s13 = smov %s831_s16  ;;  %17 = sbr.rel (!%p15_p12) target bundleno = 6 (0x6), region = 93 }
 0x22f   :  { %360 = vsyncpa [#allocation6], 1 }
 0x230   :  { %362 = vsyncpa [#allocation6 + $0x1], 1 }
 0x231   :  { %363 = vsyncpa [#allocation8], 1 }
 0x232   :  { %365 = vsyncpa [#allocation8 + $0x1], 1 }

</bundles_post_ra>
